<compile_context>
chip_gen: v7x
topology: tpu7x:2x2x1
jax: 0.10.0
libtpu: 0.0.40
codegen_flags: <defaults>
</compile_context>

<pallas_src>
import functools

import jax
import jax.numpy as jnp
from jax.experimental import pallas as pl
from jax.experimental.pallas import tpu as pltpu

BN_EPS = 1e-5
LEAKY_SLOPE = 0.1
LANE = 128
_MIB = 1024 * 1024


def _round_up(x, m):
    return (x + m - 1) // m * m


def _vmem_capacity_bytes():
    try:
        return int(pltpu.get_tpu_info().vmem_capacity_bytes)
    except Exception:
        return 64 * _MIB  # conservative fallback (v7x per-TC)


_VMEM_CAP = _vmem_capacity_bytes()


def _plan_tiles(kp, cp):
    """Generation-aware VMEM limit and the largest M tile that fits it."""
    vmem_limit = 100 * _MIB if _VMEM_CAP >= 112 * _MIB else 48 * _MIB
    weights = kp * cp * 2 * 2                     # resident bf16 weights (x2 buffering safety)
    budget = vmem_limit - weights - 2 * _MIB
    # double-buffered bf16 patches + double-buffered bf16 y + f32 matmul result
    per_row = kp * 2 * 2 + cp * 2 * 2 + cp * 4
    tm = 128
    for cand in (1024, 512, 256, 128):
        if cand * per_row <= budget:
            tm = cand
            break
    return tm, vmem_limit


def _conv_stats_kernel(p_ref, w_ref, y_ref, stat_ref, *, m_total, tm):
    # p_ref: (TM, Kp) bf16, w_ref: (Kp, Cp) bf16
    # y_ref: (TM, Cp) bf16 conv result, stat_ref: (1, 2, Cp) f32 [sum; centered sumsq]
    i = pl.program_id(0)
    y = jnp.dot(p_ref[...], w_ref[...], preferred_element_type=jnp.float32)  # (TM, Cp) f32
    y_ref[...] = y.astype(jnp.bfloat16)

    valid_i = jnp.minimum(tm, m_total - i * tm)                   # real rows in this tile
    valid_f = valid_i.astype(jnp.float32)
    s = jnp.sum(y, axis=0, keepdims=True)                         # (1, Cp); zero-pad rows add 0
    mu = s / valid_f                                              # per-channel tile mean
    rows = jax.lax.broadcasted_iota(jnp.int32, (tm, 1), 0)
    mask = (rows < valid_i).astype(jnp.float32)                   # exclude zero-padded rows
    c = (y - mu) * mask
    m2 = jnp.sum(c * c, axis=0, keepdims=True)                    # centered sum of squares
    stat_ref[...] = jnp.concatenate([s, m2], axis=0)[None, :, :]  # (1, 2, Cp)


def _apply_kernel(y_ref, scale_ref, shift_ref, o_ref):
    # y_ref: (TM, Cp) bf16, scale/shift: (1, Cp) f32, o_ref: (Cp, TM) f32 (channel-major)
    y = y_ref[...].astype(jnp.float32)
    y = y * scale_ref[...] + shift_ref[...]                       # fused BN affine
    y = jnp.where(y >= 0, y, LEAKY_SLOPE * y)                     # LeakyReLU(0.1)
    o_ref[...] = y.T                                              # XLU transpose -> channel-major store


def _im2col_3d(x, taps_pad, k=3, stride=2, pad=1):
    # x: (N, C, D, H, W) f32 -> (N*Do*Ho*Wo, C*taps_pad) bf16 patches (K pad folded into tap axis)
    n, c, d, h, w = x.shape
    xp = jnp.pad(x, ((0, 0), (0, 0), (pad, pad), (pad, pad), (pad, pad))).astype(jnp.bfloat16)
    do = (d + 2 * pad - k) // stride + 1
    ho = (h + 2 * pad - k) // stride + 1
    wo = (w + 2 * pad - k) // stride + 1
    cols = []
    for kd in range(k):
        for kh in range(k):
            for kw in range(k):
                cols.append(
                    xp[:, :,
                       kd:kd + (do - 1) * stride + 1:stride,
                       kh:kh + (ho - 1) * stride + 1:stride,
                       kw:kw + (wo - 1) * stride + 1:stride])     # (N, C, Do, Ho, Wo)
    cols = jnp.stack(cols, axis=-1)                               # (N, C, Do, Ho, Wo, 27)
    taps = k * k * k
    if taps_pad > taps:
        cols = jnp.pad(cols, ((0, 0),) * 5 + ((0, taps_pad - taps),))
    cols = jnp.transpose(cols, (0, 2, 3, 4, 1, 5))                # (N, Do, Ho, Wo, C, taps_pad)
    patches = cols.reshape(n * do * ho * wo, c * taps_pad)
    return patches, (do, ho, wo)


@jax.jit
def downsample_forward(x, conv_w, conv_b, bn_gamma, bn_beta):
    # x: (N, Cin, D, H, W); conv_w: (Cout, Cin, 3, 3, 3)
    # conv_b unused: exactly cancelled by training-mode BN mean subtraction (eval mode would need it).
    del conv_b
    n, cin = x.shape[0], x.shape[1]
    cout = conv_w.shape[0]
    taps = 27
    kdim = cin * taps
    kp = _round_up(kdim, LANE)                 # contraction dim padded to 128 (full MXU tiles)
    cp = _round_up(cout, LANE)                 # lane-dense output channels
    taps_pad = kp // cin if kp % cin == 0 else taps   # fold K pad into the tap axis when possible

    patches, (do, ho, wo) = _im2col_3d(x, taps_pad, k=3, stride=2, pad=1)
    m = patches.shape[0]
    if patches.shape[1] < kp:                  # rare fallback (kp not divisible by Cin)
        patches = jnp.pad(patches, ((0, 0), (0, kp - patches.shape[1])))

    tm, vmem_limit = _plan_tiles(kp, cp)
    tm_eff = tm if m >= tm else _round_up(m, 16)     # 16: bf16 packed sublane pairs
    mp = _round_up(m, tm_eff)
    num_tiles = mp // tm_eff
    if mp > m:
        patches = jnp.pad(patches, ((0, mp - m), (0, 0)))

    # Weight matrix laid out to match the patch layout: (Cin, taps_pad) flattened -> Kp.
    w_mat = conv_w.reshape(cout, cin, taps)
    if taps_pad > taps:
        w_mat = jnp.pad(w_mat, ((0, 0), (0, 0), (0, taps_pad - taps)))
    w_mat = w_mat.reshape(cout, cin * taps_pad)
    w_mat = jnp.pad(w_mat, ((0, cp - cout), (0, kp - cin * taps_pad)))
    w_mat = w_mat.T.astype(jnp.bfloat16)              # (Kp, Cp)

    cparams = pltpu.CompilerParams(
        dimension_semantics=("parallel",),            # shard M tiles across TCs (v7x megacore)
        vmem_limit_bytes=vmem_limit,
    )

    # ---- Pass 1: tiled conv matmul -> y (bf16) + per-tile centered BN partial stats ----
    conv_out, stats = pl.pallas_call(
        functools.partial(_conv_stats_kernel, m_total=m, tm=tm_eff),
        out_shape=(jax.ShapeDtypeStruct((mp, cp), jnp.bfloat16),
                   jax.ShapeDtypeStruct((num_tiles, 2, cp), jnp.float32)),
        grid=(num_tiles,),
        in_specs=[
            pl.BlockSpec((tm_eff, kp), lambda i: (i, 0)),   # patches tile (double-buffered)
            pl.BlockSpec((kp, cp), lambda i: (0, 0)),       # weights resident across the grid
        ],
        out_specs=(
            pl.BlockSpec((tm_eff, cp), lambda i: (i, 0)),
            pl.BlockSpec((1, 2, cp), lambda i: (i, 0, 0)),
        ),
        compiler_params=cparams,
    )(patches, w_mat)

    # ---- Combine per-tile (count, sum, centered-M2) with Chan's parallel formula ----
    counts = jnp.minimum(tm_eff, m - jnp.arange(num_tiles) * tm_eff).astype(jnp.float32)  # (T,)
    sums = stats[:, 0, :]                                  # (T, Cp)
    m2s = stats[:, 1, :]                                   # (T, Cp)
    mean = jnp.sum(sums, axis=0) / m                       # (Cp,)
    tile_means = sums / counts[:, None]
    m2 = jnp.sum(m2s, axis=0) + jnp.sum(counts[:, None] * (tile_means - mean[None, :]) ** 2, axis=0)
    var = jnp.maximum(m2 / m, 0.0)                         # biased batch variance

    gamma_p = jnp.pad(bn_gamma, (0, cp - cout))
    beta_p = jnp.pad(bn_beta, (0, cp - cout))
    scale_v = gamma_p * jax.lax.rsqrt(var + BN_EPS)        # (Cp,)
    shift_v = beta_p - mean * scale_v
    scale = scale_v.reshape(1, cp)
    shift = shift_v.reshape(1, cp)

    # ---- Pass 2: elementwise BN affine + LeakyReLU, channel-major store ----
    out_cm = pl.pallas_call(
        _apply_kernel,
        out_shape=jax.ShapeDtypeStruct((cp, mp), jnp.float32),
        grid=(num_tiles,),
        in_specs=[
            pl.BlockSpec((tm_eff, cp), lambda i: (i, 0)),
            pl.BlockSpec((1, cp), lambda i: (0, 0)),
            pl.BlockSpec((1, cp), lambda i: (0, 0)),
        ],
        out_specs=pl.BlockSpec((cp, tm_eff), lambda i: (0, i)),
        compiler_params=cparams,
    )(conv_out, scale, shift)

    # (Cp, Mp) -> slice real channels/rows -> (Cout, N, Do, Ho, Wo) -> NCDHW (leading-dim swap only)
    out = out_cm[:cout, :m].reshape(cout, n, do, ho, wo)
    return jnp.transpose(out, (1, 0, 2, 3, 4))


def _reference(x, conv_w, conv_b, bn_gamma, bn_beta):
    # Pure-JAX f32 reference of Conv3d(s=2, p=1, bias) + training-mode BN + LeakyReLU.
    y = jax.lax.conv_general_dilated(
        x, conv_w, window_strides=(2, 2, 2), padding=((1, 1), (1, 1), (1, 1)),
        dimension_numbers=("NCDHW", "OIDHW", "NCDHW"),
        precision=jax.lax.Precision.HIGHEST)
    y = y + conv_b.reshape(1, -1, 1, 1, 1)
    mean = jnp.mean(y, axis=(0, 2, 3, 4), keepdims=True)
    var = jnp.mean((y - mean) ** 2, axis=(0, 2, 3, 4), keepdims=True)
    y = (y - mean) * jax.lax.rsqrt(var + BN_EPS)
    y = y * bn_gamma.reshape(1, -1, 1, 1, 1) + bn_beta.reshape(1, -1, 1, 1, 1)
    return jnp.where(y >= 0, y, LEAKY_SLOPE * y)


if __name__ == "__main__":
    key = jax.random.PRNGKey(0)
    k_x, k_w, k_b, k_g, k_be = jax.random.split(key, 5)

    N, Cin, Cout, D, H, W = 2, 4, 8, 8, 8, 8
    x = jax.random.normal(k_x, (N, Cin, D, H, W), dtype=jnp.float32)

    # Deterministic synthetic parameters (shapes from nn.Conv3d / nn.BatchNorm3d).
    conv_w = 0.1 * jax.random.normal(k_w, (Cout, Cin, 3, 3, 3), dtype=jnp.float32)
    conv_b = 0.05 * jax.random.normal(k_b, (Cout,), dtype=jnp.float32)
    bn_gamma = 1.0 + 0.1 * jax.random.normal(k_g, (Cout,), dtype=jnp.float32)
    bn_beta = 0.1 * jax.random.normal(k_be, (Cout,), dtype=jnp.float32)

    out = downsample_forward(x, conv_w, conv_b, bn_gamma, bn_beta)
    out = jax.block_until_ready(out)

    ref = _reference(x, conv_w, conv_b, bn_gamma, bn_beta)
    assert out.shape == (N, Cout, D // 2, H // 2, W // 2), out.shape
    # bf16 matmul inputs + bf16 conv-result storage (f32 accumulate) vs f32 HIGHEST reference.
    max_err = float(jnp.max(jnp.abs(out - ref)))
    assert jnp.allclose(out, ref, atol=3e-2, rtol=3e-2), max_err

    print("KERNEL_OK")
</pallas_src>

<mosaic_0001>
module attributes {stable_mosaic.version = 11 : i64} {
  func.func @_conv_stats_kernel(%arg0: i32, %arg1: memref<128x128xbf16, #tpu.memory_space<vmem>>, %arg2: memref<128x128xbf16, #tpu.memory_space<vmem>>, %arg3: memref<128x128xbf16, #tpu.memory_space<vmem>>, %arg4: memref<1x2x128xf32, #tpu.memory_space<vmem>>) attributes {dimension_semantics = [#tpu.dimension_semantics<parallel>], iteration_bounds = array<i64: 1>, scalar_prefetch = 0 : i64, scratch_operands = 0 : i64, tpu.core_type = #tpu.core_type<tc>, window_params = [{transform_indices = @transform_0, window_bounds = array<i64: 128, 128>}, {pipeline_mode = #tpu.pipeline_mode<synchronous>, transform_indices = @transform_1, window_bounds = array<i64: 128, 128>}, {transform_indices = @transform_2, window_bounds = array<i64: 128, 128>}, {transform_indices = @transform_3, window_bounds = array<i64: 1, 2, 128>}]} {
    %c0 = arith.constant 0 : index
    %c0_0 = arith.constant 0 : index
    %0 = vector.load %arg1[%c0, %c0_0] : memref<128x128xbf16, #tpu.memory_space<vmem>>, vector<128x128xbf16>
    %c0_1 = arith.constant 0 : index
    %c0_2 = arith.constant 0 : index
    %1 = vector.load %arg2[%c0_1, %c0_2] : memref<128x128xbf16, #tpu.memory_space<vmem>>, vector<128x128xbf16>
    %cst = arith.constant dense<0.000000e+00> : vector<128x128xf32>
    %2 = tpu.matmul %0, %1, %cst {dimension_numbers = #tpu.dot_dimension_numbers<[1], [0], [0], [1], [0, 0, 1, 1], [], []>} : vector<128x128xbf16>, vector<128x128xbf16>, vector<128x128xf32> -> vector<128x128xf32>
    %3 = arith.truncf %2 : vector<128x128xf32> to vector<128x128xbf16>
    %c0_3 = arith.constant 0 : index
    %c0_4 = arith.constant 0 : index
    %4 = vector.load %arg3[%c0_3, %c0_4] : memref<128x128xbf16, #tpu.memory_space<vmem>>, vector<128x128xbf16>
    tpu.vector_store %arg3[%c0_3, %c0_4], %3 {strides = array<i32>} : memref<128x128xbf16, #tpu.memory_space<vmem>>, vector<128x128xbf16>,
    %c128_i32 = arith.constant 128 : i32
    %5 = arith.muli %arg0, %c128_i32 : i32
    %c128_i32_5 = arith.constant 128 : i32
    %6 = arith.subi %c128_i32_5, %5 : i32
    %c128_i32_6 = arith.constant 128 : i32
    %7 = arith.minsi %c128_i32_6, %6 : i32
    %8 = arith.sitofp %7 : i32 to f32
    %cst_7 = arith.constant dense<0.000000e+00> : vector<128xf32>
    %9 = vector.multi_reduction <add>, %2, %cst_7 [0] : vector<128x128xf32> to vector<128xf32>
    %10 = vector.shape_cast %9 : vector<128xf32> to vector<1x128xf32>
    %11 = vector.broadcast %8 : f32 to vector<1x128xf32>
    %12 = arith.divf %10, %11 : vector<1x128xf32>
    %13 = tpu.iota {dimensions = array<i32: 0>} : vector<128x1xi32>
    %14 = vector.broadcast %7 : i32 to vector<128x1xi32>
    %15 = arith.cmpi slt, %13, %14 : vector<128x1xi32>
    %16 = arith.extui %15 : vector<128x1xi1> to vector<128x1xi32>
    %17 = arith.sitofp %16 : vector<128x1xi32> to vector<128x1xf32>
    %18 = vector.broadcast %12 : vector<1x128xf32> to vector<128x128xf32>
    %19 = arith.subf %2, %18 : vector<128x128xf32>
    %20 = vector.broadcast %17 : vector<128x1xf32> to vector<128x128xf32>
    %21 = arith.mulf %19, %20 : vector<128x128xf32>
    %22 = arith.mulf %21, %21 : vector<128x128xf32>
    %cst_8 = arith.constant dense<0.000000e+00> : vector<128xf32>
    %23 = vector.multi_reduction <add>, %22, %cst_8 [0] : vector<128x128xf32> to vector<128xf32>
    %24 = vector.shape_cast %23 : vector<128xf32> to vector<1x128xf32>
    %25 = tpu.concatenate %10, %24 in 0 : vector<1x128xf32>, vector<1x128xf32> -> vector<2x128xf32>
    %26 = vector.shape_cast %25 : vector<2x128xf32> to vector<1x2x128xf32>
    %c0_9 = arith.constant 0 : index
    %c0_10 = arith.constant 0 : index
    %c0_11 = arith.constant 0 : index
    %27 = vector.load %arg4[%c0_9, %c0_10, %c0_11] : memref<1x2x128xf32, #tpu.memory_space<vmem>>, vector<1x2x128xf32>
    tpu.vector_store %arg4[%c0_9, %c0_10, %c0_11], %26 {strides = array<i32>} : memref<1x2x128xf32, #tpu.memory_space<vmem>>, vector<1x2x128xf32>,
    return
  }
  func.func @transform_0(%arg0: i32) -> (i32, i32) {
    %c0_i32 = arith.constant 0 : i32
    %c0_i32_0 = arith.constant 0 : i32
    return %arg0, %c0_i32 : i32, i32
  }
  func.func @transform_1(%arg0: i32) -> (i32, i32) {
    %c0_i32 = arith.constant 0 : i32
    %c0_i32_0 = arith.constant 0 : i32
    %c0_i32_1 = arith.constant 0 : i32
    return %c0_i32, %c0_i32_0 : i32, i32
  }
  func.func @transform_2(%arg0: i32) -> (i32, i32) {
    %c0_i32 = arith.constant 0 : i32
    %c0_i32_0 = arith.constant 0 : i32
    return %arg0, %c0_i32 : i32, i32
  }
  func.func @transform_3(%arg0: i32) -> (i32, i32, i32) {
    %c0_i32 = arith.constant 0 : i32
    %c0_i32_0 = arith.constant 0 : i32
    %c0_i32_1 = arith.constant 0 : i32
    return %arg0, %c0_i32, %c0_i32_0 : i32, i32, i32
  }
}

module attributes {stable_mosaic.version = 11 : i64} {
  func.func @_apply_kernel(%arg0: i32, %arg1: memref<128x128xbf16, #tpu.memory_space<vmem>>, %arg2: memref<1x128xf32, #tpu.memory_space<vmem>>, %arg3: memref<1x128xf32, #tpu.memory_space<vmem>>, %arg4: memref<128x128xf32, #tpu.memory_space<vmem>>) attributes {dimension_semantics = [#tpu.dimension_semantics<parallel>], iteration_bounds = array<i64: 1>, scalar_prefetch = 0 : i64, scratch_operands = 0 : i64, tpu.core_type = #tpu.core_type<tc>, window_params = [{transform_indices = @transform_0, window_bounds = array<i64: 128, 128>}, {pipeline_mode = #tpu.pipeline_mode<synchronous>, transform_indices = @transform_1, window_bounds = array<i64: 1, 128>}, {pipeline_mode = #tpu.pipeline_mode<synchronous>, transform_indices = @transform_2, window_bounds = array<i64: 1, 128>}, {transform_indices = @transform_3, window_bounds = array<i64: 128, 128>}]} {
    %c0 = arith.constant 0 : index
    %c0_0 = arith.constant 0 : index
    %0 = vector.load %arg1[%c0, %c0_0] : memref<128x128xbf16, #tpu.memory_space<vmem>>, vector<128x128xbf16>
    %1 = arith.extf %0 : vector<128x128xbf16> to vector<128x128xf32>
    %c0_1 = arith.constant 0 : index
    %c0_2 = arith.constant 0 : index
    %2 = vector.load %arg2[%c0_1, %c0_2] : memref<1x128xf32, #tpu.memory_space<vmem>>, vector<1x128xf32>
    %3 = vector.broadcast %2 : vector<1x128xf32> to vector<128x128xf32>
    %4 = arith.mulf %1, %3 : vector<128x128xf32>
    %c0_3 = arith.constant 0 : index
    %c0_4 = arith.constant 0 : index
    %5 = vector.load %arg3[%c0_3, %c0_4] : memref<1x128xf32, #tpu.memory_space<vmem>>, vector<1x128xf32>
    %6 = vector.broadcast %5 : vector<1x128xf32> to vector<128x128xf32>
    %7 = arith.addf %4, %6 : vector<128x128xf32>
    %cst = arith.constant 0.000000e+00 : f32
    %8 = vector.broadcast %cst : f32 to vector<128x128xf32>
    %9 = arith.cmpf oge, %7, %8 : vector<128x128xf32>
    %cst_5 = arith.constant 1.000000e-01 : f32
    %10 = vector.broadcast %cst_5 : f32 to vector<128x128xf32>
    %11 = arith.mulf %10, %7 : vector<128x128xf32>
    %12 = arith.select %9, %7, %11 : vector<128x128xi1>, vector<128x128xf32>
    %13 = tpu.transpose %12, [1, 0] : vector<128x128xf32> -> vector<128x128xf32>
    %c0_6 = arith.constant 0 : index
    %c0_7 = arith.constant 0 : index
    %14 = vector.load %arg4[%c0_6, %c0_7] : memref<128x128xf32, #tpu.memory_space<vmem>>, vector<128x128xf32>
    tpu.vector_store %arg4[%c0_6, %c0_7], %13 {strides = array<i32>} : memref<128x128xf32, #tpu.memory_space<vmem>>, vector<128x128xf32>,
    return
  }
  func.func @transform_0(%arg0: i32) -> (i32, i32) {
    %c0_i32 = arith.constant 0 : i32
    %c0_i32_0 = arith.constant 0 : i32
    return %arg0, %c0_i32 : i32, i32
  }
  func.func @transform_1(%arg0: i32) -> (i32, i32) {
    %c0_i32 = arith.constant 0 : i32
    %c0_i32_0 = arith.constant 0 : i32
    %c0_i32_1 = arith.constant 0 : i32
    return %c0_i32, %c0_i32_0 : i32, i32
  }
  func.func @transform_2(%arg0: i32) -> (i32, i32) {
    %c0_i32 = arith.constant 0 : i32
    %c0_i32_0 = arith.constant 0 : i32
    %c0_i32_1 = arith.constant 0 : i32
    return %c0_i32, %c0_i32_0 : i32, i32
  }
  func.func @transform_3(%arg0: i32) -> (i32, i32) {
    %c0_i32 = arith.constant 0 : i32
    %c0_i32_0 = arith.constant 0 : i32
    return %c0_i32, %arg0 : i32, i32
  }
}

</mosaic_0001>

<bundles_post_ra>
// kernel: downsample_forward.3
= control target key start
LH: loop header
LB: loop body
LE: loop exit
PB: predicated region body
PF: predicated region fallthrough
CT: control target
= control target key end

     0   :  { %s367_s0 = inlined_call_operand.vmem [shape: bf16[128,128], index: 0, kind: input, shape index: {}]   ;;  %s368_s1 = inlined_call_operand.vmem [shape: f32[1,128], index: 1, kind: input, shape index: {}]   ;;  %s369_s2 = inlined_call_operand.vmem [shape: f32[1,128], index: 2, kind: input, shape index: {}]   ;;  %s370_s3 = inlined_call_operand.vmem [shape: f32[128,128], index: 3, kind: output, shape index: {}]  }
   0x1   :  { %v195_v0 = vld [vmem:[%s367_s0] sm:$0xff]   ;;  %v226_v4 = vld [vmem:[%s367_s0 + $0x8] sm:$0xff]   ;;  %v227_v10 = vld [vmem:[%s367_s0 + $0x10] sm:$0xff]  }
   0x2   :  { %v259_v1 = vld [vmem:[%s368_s1] ss:$0 sm:$0xff]  ;;  %v196_v2 = vunpack.c.l.bf16 %v195_v0  ;;  %v197_v3 = vunpack.c.h.bf16 %v195_v0  ;;  %v200_v6 = vunpack.c.l.bf16 %v226_v4  ;;  %v201_v7 = vunpack.c.h.bf16 %v226_v4  ;;  %v228_v25 = vld [vmem:[%s367_s0 + $0x18] sm:$0xff]   ;;  %v230_v47 = vld [vmem:[%s367_s0 + $0x28] sm:$0xff]  }
   0x3   :  { %v267_v5 = vld [vmem:[%s369_s2] ss:$0 sm:$0xff]  ;;  %v204_v15 = vunpack.c.l.bf16 %v227_v10  ;;  %v205_v20 = vunpack.c.h.bf16 %v227_v10  ;;  %v208_v26 = vunpack.c.l.bf16 %v228_v25  ;;  %v209_v31 = vunpack.c.h.bf16 %v228_v25  ;;  %v231_v58 = vld [vmem:[%s367_s0 + $0x30] sm:$0xff]  }
   0x4   :  { %v53_v8 = vmul.f32 %v196_v2, %v259_v1  ;;  %v54_v9 = vmul.f32 %v197_v3, %v259_v1  ;;  %v55_v11 = vmul.f32 %v200_v6, %v259_v1  ;;  %v56_v14 = vmul.f32 %v201_v7, %v259_v1  ;;  %v229_v36 = vld [vmem:[%s367_s0 + $0x20] sm:$0xff]   ;;  %v232_v7 = vld [vmem:[%s367_s0 + $0x38] sm:$0xff]  }
   0x5   :  { %v57_v24 = vmul.f32 %v204_v15, %v259_v1  ;;  %v58_v30 = vmul.f32 %v205_v20, %v259_v1  ;;  %v59_v35 = vmul.f32 %v208_v26, %v259_v1  ;;  %v60_v37 = vmul.f32 %v209_v31, %v259_v1 }
   0x6   :  { %v76_v12 = vadd.f32 %v267_v5, %v53_v8  ;;  %v77_v13 = vadd.f32 %v267_v5, %v54_v9  ;;  %v78_v18 = vadd.f32 %v267_v5, %v55_v11  ;;  %v79_v23 = vadd.f32 %v267_v5, %v56_v14 }
   0x7   :  { %v80_v29 = vadd.f32 %v267_v5, %v57_v24  ;;  %v81_v34 = vadd.f32 %v267_v5, %v58_v30  ;;  %v82_v40 = vadd.f32 %v267_v5, %v59_v35  ;;  %v212_v41 = vunpack.c.l.bf16 %v229_v36 }
   0x8   :  { %vm92_vm0 = vcmp.ge.f32.partialorder %v76_v12, 0.0  ;;  %v108_v16 = vmul.f32 0.1, %v76_v12  ;;  %v109_v17 = vmul.f32 0.1, %v77_v13  ;;  %vm93_vm1 = vcmp.ge.f32.partialorder %v77_v13, 0.0 }
   0x9   :  { %v110_v22 = vmul.f32 0.1, %v78_v18  ;;  %vm94_vm2 = vcmp.ge.f32.partialorder %v78_v18, 0.0  ;;  %v111_v28 = vmul.f32 0.1, %v79_v23  ;;  %vm95_vm3 = vcmp.ge.f32.partialorder %v79_v23, 0.0 }
   0xa   :  { %v124_v19 = vsel %vm92_vm0, %v76_v12, %v108_v16  ;;  %v125_v21 = vsel %vm93_vm1, %v77_v13, %v109_v17  ;;  %v112_v33 = vmul.f32 0.1, %v80_v29  ;;  %vm96_vm4 = vcmp.ge.f32.partialorder %v80_v29, 0.0 }
   0xb   :  { %140 = vxpose.xlu0.b32.start [1/16] %v124_v19, 128  ;;  %v126_v27 = vsel %vm94_vm2, %v78_v18, %v110_v22  ;;  %v127_v32 = vsel %vm95_vm3, %v79_v23, %v111_v28  ;;  %v113_v39 = vmul.f32 0.1, %v81_v34  ;;  %vm97_vm5 = vcmp.ge.f32.partialorder %v81_v34, 0.0 }
   0xc   :  { %v128_v38 = vsel %vm96_vm4, %v80_v29, %v112_v33  ;;  %v83_v42 = vadd.f32 %v267_v5, %v60_v37  ;;  %v114_v44 = vmul.f32 0.1, %v82_v40  ;;  %v61_v45 = vmul.f32 %v212_v41, %v259_v1 }
   0xd   :  { %v129_v43 = vsel %vm97_vm5, %v81_v34, %v113_v39  ;;  %v213_v46 = vunpack.c.h.bf16 %v229_v36  ;;  %vm98_vm6 = vcmp.ge.f32.partialorder %v82_v40, 0.0  ;;  %v216_v48 = vunpack.c.l.bf16 %v230_v47 }
   0xe   :  { %v130_v49 = vsel %vm98_vm6, %v82_v40, %v114_v44  ;;  %v115_v50 = vmul.f32 0.1, %v83_v42  ;;  %v84_v51 = vadd.f32 %v267_v5, %v61_v45  ;;  %vm99_vm7 = vcmp.ge.f32.partialorder %v83_v42, 0.0 }
   0xf   :  { %141 = vxpose.xlu0.b32.cont [2/16] %v125_v21, 128  ;;  %v62_v52 = vmul.f32 %v213_v46, %v259_v1  ;;  %v217_v53 = vunpack.c.h.bf16 %v230_v47  ;;  %v63_v57 = vmul.f32 %v216_v48, %v259_v1  ;;  %v220_v63 = vunpack.c.l.bf16 %v231_v58 }
  0x10   :  { %v131_v54 = vsel %vm99_vm7, %v83_v42, %v115_v50  ;;  %v116_v55 = vmul.f32 0.1, %v84_v51  ;;  %vm100_vm8 = vcmp.ge.f32.partialorder %v84_v51, 0.0  ;;  %v221_v0 = vunpack.c.h.bf16 %v231_v58 }
  0x11   :  { %v85_v56 = vadd.f32 %v267_v5, %v62_v52  ;;  %v64_v59 = vmul.f32 %v217_v53, %v259_v1  ;;  %v86_v62 = vadd.f32 %v267_v5, %v63_v57  ;;  %v65_v6 = vmul.f32 %v220_v63, %v259_v1 }
  0x12   :  { %v132_v60 = vsel %vm100_vm8, %v84_v51, %v116_v55  ;;  %v66_v8 = vmul.f32 %v221_v0, %v259_v1  ;;  %v224_v12 = vunpack.c.l.bf16 %v232_v7  ;;  %v225_v13 = vunpack.c.h.bf16 %v232_v7 }
  0x13   :  { %142 = vxpose.xlu0.b32.cont [3/16] %v126_v27, 128  ;;  %v117_v61 = vmul.f32 0.1, %v85_v56  ;;  %vm101_vm9 = vcmp.ge.f32.partialorder %v85_v56, 0.0  ;;  %v118_v3 = vmul.f32 0.1, %v86_v62  ;;  %v87_v4 = vadd.f32 %v267_v5, %v64_v59 }
  0x14   :  { %vm102_vm10 = vcmp.ge.f32.partialorder %v86_v62, 0.0  ;;  %v88_v11 = vadd.f32 %v267_v5, %v65_v6  ;;  %v89_v16 = vadd.f32 %v267_v5, %v66_v8  ;;  %v67_v17 = vmul.f32 %v224_v12, %v259_v1 }
  0x15   :  { %v133_v2 = vsel %vm101_vm9, %v85_v56, %v117_v61  ;;  %v134_v9 = vsel %vm102_vm10, %v86_v62, %v118_v3  ;;  %v119_v10 = vmul.f32 0.1, %v87_v4  ;;  %vm103_vm11 = vcmp.ge.f32.partialorder %v87_v4, 0.0 }
  0x16   :  { %v120_v15 = vmul.f32 0.1, %v88_v11  ;;  %vm104_vm12 = vcmp.ge.f32.partialorder %v88_v11, 0.0  ;;  %v121_v19 = vmul.f32 0.1, %v89_v16  ;;  %v90_v20 = vadd.f32 %v267_v5, %v67_v17 }
  0x17   :  { %143 = vxpose.xlu0.b32.cont [4/16] %v127_v32, 128  ;;  %v135_v14 = vsel %vm103_vm11, %v87_v4, %v119_v10  ;;  %v68_v21 = vmul.f32 %v225_v13, %v259_v1  ;;  %vm105_vm13 = vcmp.ge.f32.partialorder %v89_v16, 0.0 }
  0x18   :  { %v136_v18 = vsel %vm104_vm12, %v88_v11, %v120_v15  ;;  %v137_v22 = vsel %vm105_vm13, %v89_v16, %v121_v19  ;;  %v122_v23 = vmul.f32 0.1, %v90_v20  ;;  %vm106_vm14 = vcmp.ge.f32.partialorder %v90_v20, 0.0 }
  0x19   :  { %v91_v24 = vadd.f32 %v267_v5, %v68_v21 }
  0x1a   :  { %v138_v25 = vsel %vm106_vm14, %v90_v20, %v122_v23 }
  0x1b   :  { %144 = vxpose.xlu0.b32.cont [5/16] %v128_v38, 128  ;;  %v123_v26 = vmul.f32 0.1, %v91_v24  ;;  %vm107_vm15 = vcmp.ge.f32.partialorder %v91_v24, 0.0 }
  0x1d   :  { %v139_v27 = vsel %vm107_vm15, %v91_v24, %v123_v26 }
  0x1f   :  { %145 = vxpose.xlu0.b32.cont [6/16] %v129_v43, 128 }
  0x23   :  { %146 = vxpose.xlu0.b32.cont [7/16] %v130_v49, 128 }
  0x27   :  { %147 = vxpose.xlu0.b32.cont [8/16] %v131_v54, 128 }
  0x2b   :  { %148 = vxpose.xlu0.b32.cont [9/16] %v132_v60, 128 }
  0x2f   :  { %149 = vxpose.xlu0.b32.cont [10/16] %v133_v2, 128 }
  0x33   :  { %150 = vxpose.xlu0.b32.cont [11/16] %v134_v9, 128 }
  0x37   :  { %151 = vxpose.xlu0.b32.cont [12/16] %v135_v14, 128 }
  0x3b   :  { %152 = vxpose.xlu0.b32.cont [13/16] %v136_v18, 128 }
  0x3f   :  { %153 = vxpose.xlu0.b32.cont [14/16] %v137_v22, 128 }
  0x43   :  { %154 = vxpose.xlu0.b32.cont [15/16] %v138_v25, 128 }
  0x47   :  { %155 = vxpose.xlu0.b32.end [16/16] %v139_v27, 128 }
  0x8b   :  { %v156_v28 = vpop.trf.xlu0 }
  0x8c   :  { %172 = vst [vmem:[%s370_s3] sm:$0xff] %v156_v28 }
  0x8f   :  { %v157_v1 = vpop.trf.xlu0 }
  0x90   :  { %173 = vst [vmem:[%s370_s3 + $0x8] sm:$0xff] %v157_v1 }
  0x93   :  { %v158_v29 = vpop.trf.xlu0 }
  0x94   :  { %174 = vst [vmem:[%s370_s3 + $0x10] sm:$0xff] %v158_v29 }
  0x97   :  { %v159_v5 = vpop.trf.xlu0 }
  0x98   :  { %175 = vst [vmem:[%s370_s3 + $0x18] sm:$0xff] %v159_v5 }
  0x9b   :  { %v160_v30 = vpop.trf.xlu0 }
  0x9c   :  { %176 = vst [vmem:[%s370_s3 + $0x20] sm:$0xff] %v160_v30 }
  0x9f   :  { %v161_v31 = vpop.trf.xlu0 }
  0xa0   :  { %177 = vst [vmem:[%s370_s3 + $0x28] sm:$0xff] %v161_v31 }
  0xa3   :  { %v162_v32 = vpop.trf.xlu0 }
  0xa4   :  { %178 = vst [vmem:[%s370_s3 + $0x30] sm:$0xff] %v162_v32 }
  0xa7   :  { %v163_v33 = vpop.trf.xlu0 }
  0xa8   :  { %179 = vst [vmem:[%s370_s3 + $0x38] sm:$0xff] %v163_v33 }
  0xab   :  { %v164_v34 = vpop.trf.xlu0 }
  0xac   :  { %180 = vst [vmem:[%s370_s3 + $0x40] sm:$0xff] %v164_v34 }
  0xaf   :  { %v165_v35 = vpop.trf.xlu0 }
  0xb0   :  { %181 = vst [vmem:[%s370_s3 + $0x48] sm:$0xff] %v165_v35 }
  0xb3   :  { %v166_v36 = vpop.trf.xlu0 }
  0xb4   :  { %182 = vst [vmem:[%s370_s3 + $0x50] sm:$0xff] %v166_v36 }
  0xb7   :  { %v167_v37 = vpop.trf.xlu0 }
  0xb8   :  { %183 = vst [vmem:[%s370_s3 + $0x58] sm:$0xff] %v167_v37 }
  0xbb   :  { %v168_v38 = vpop.trf.xlu0 }
  0xbc   :  { %184 = vst [vmem:[%s370_s3 + $0x60] sm:$0xff] %v168_v38 }
  0xbf   :  { %v169_v39 = vpop.trf.xlu0 }
  0xc0   :  { %185 = vst [vmem:[%s370_s3 + $0x68] sm:$0xff] %v169_v39 }
  0xc3   :  { %v170_v40 = vpop.trf.xlu0 }
  0xc4   :  { %186 = vst [vmem:[%s370_s3 + $0x70] sm:$0xff] %v170_v40 }
  0xc7   :  { %v171_v41 = vpop.trf.xlu0 }
  0xc8   :  { %187 = vst [vmem:[%s370_s3 + $0x78] sm:$0xff] %v171_v41 }

// kernel: downsample_forward.2
= control target key start
LH: loop header
LB: loop body
LE: loop exit
PB: predicated region body
PF: predicated region fallthrough
CT: control target
= control target key end

     0   :  { %vm483_vm0 = vcmask 1040384   ;;  %s769_s1 = inlined_call_operand.vmem [shape: bf16[128,128], index: 1, kind: input, shape index: {}]   ;;  %s770_s0 = inlined_call_operand.vmem [shape: bf16[128,128], index: 0, kind: input, shape index: {}]   ;;  %s771_s2 = inlined_call_operand.vmem [shape: bf16[128,128], index: 2, kind: output, shape index: {0}]   ;;  %s772_s3 = inlined_call_operand.vmem [shape: f32[1,2,128], index: 3, kind: output, shape index: {1}]  }
   0x1   :  { %v653_v0 = vld [vmem:[%s769_s1] sm:$0xff]   ;;  %v654_v1 = vld [vmem:[%s769_s1 + $0x8] sm:$0xff]   ;;  %v655_v2 = vld [vmem:[%s769_s1 + $0x10] sm:$0xff]  }
   0x2   :  { %605 = vmatprep.subr.bf16.mxu0 %v653_v0  ;;  %637 = vmatprep.subr.bf16.mxu1 %v653_v0  ;;  %v656_v3 = vld [vmem:[%s769_s1 + $0x18] sm:$0xff]   ;;  %v661_v4 = vld [vmem:[%s770_s0] sm:$0xff]   ;;  %v658_v7 = vld [vmem:[%s769_s1 + $0x28] sm:$0xff]  }
   0x3   :  { %606 = vmatpush3.bf16.msra.mxu0 %v653_v0  ;;  %645 = vmatpush3.bf16.msra.mxu1 %v653_v0  ;;  %v657_v5 = vld [vmem:[%s769_s1 + $0x20] sm:$0xff]   ;;  %v659_v8 = vld [vmem:[%s769_s1 + $0x30] sm:$0xff]   ;;  %v660_v9 = vld [vmem:[%s769_s1 + $0x38] sm:$0xff]  }
   0x4   :  { %607 = vmatprep.subr.bf16.mxu0 %v654_v1  ;;  %638 = vmatprep.subr.bf16.mxu1 %v654_v1  ;;  %v665_v6 = vld [vmem:[%s770_s0 + $0x20] sm:$0xff]   ;;  %v662_v10 = vld [vmem:[%s770_s0 + $0x8] sm:$0xff]   ;;  %v663_v12 = vld [vmem:[%s770_s0 + $0x10] sm:$0xff]  }
   0x5   :  { %621 = vmatprep.mubr.bf16.mxu0 %v661_v4  ;;  %629 = vmatprep.mubr.bf16.mxu1 %v665_v6  ;;  %v666_v11 = vld [vmem:[%s770_s0 + $0x28] sm:$0xff]   ;;  %v667_v13 = vld [vmem:[%s770_s0 + $0x30] sm:$0xff]   ;;  %v664_v14 = vld [vmem:[%s770_s0 + $0x18] sm:$0xff]  }
   0x6   :  { %v668_v15 = vld [vmem:[%s770_s0 + $0x38] sm:$0xff]  }
   0x7   :  { %608 = vmatpush3.bf16.msra.mxu0 %v654_v1  ;;  %646 = vmatpush3.bf16.msra.mxu1 %v654_v1 }
   0x8   :  { %609 = vmatprep.subr.bf16.mxu0 %v655_v2  ;;  %639 = vmatprep.subr.bf16.mxu1 %v655_v2 }
   0xb   :  { %610 = vmatpush3.bf16.msra.mxu0 %v655_v2  ;;  %647 = vmatpush3.bf16.msra.mxu1 %v655_v2 }
   0xc   :  { %611 = vmatprep.subr.bf16.mxu0 %v656_v3  ;;  %640 = vmatprep.subr.bf16.mxu1 %v656_v3 }
   0xf   :  { %612 = vmatpush3.bf16.msra.mxu0 %v656_v3  ;;  %648 = vmatpush3.bf16.msra.mxu1 %v656_v3 }
  0x10   :  { %613 = vmatprep.subr.bf16.mxu0 %v657_v5  ;;  %641 = vmatprep.subr.bf16.mxu1 %v657_v5 }
  0x13   :  { %614 = vmatpush3.bf16.msra.mxu0 %v657_v5  ;;  %649 = vmatpush3.bf16.msra.mxu1 %v657_v5 }
  0x14   :  { %615 = vmatprep.subr.bf16.mxu0 %v658_v7  ;;  %642 = vmatprep.subr.bf16.mxu1 %v658_v7 }
  0x17   :  { %616 = vmatpush3.bf16.msra.mxu0 %v658_v7  ;;  %650 = vmatpush3.bf16.msra.mxu1 %v658_v7 }
  0x18   :  { %617 = vmatprep.subr.bf16.mxu0 %v659_v8  ;;  %643 = vmatprep.subr.bf16.mxu1 %v659_v8 }
  0x1b   :  { %618 = vmatpush3.bf16.msra.mxu0 %v659_v8  ;;  %651 = vmatpush3.bf16.msra.mxu1 %v659_v8 }
  0x1c   :  { %619 = vmatprep.subr.bf16.mxu0 %v660_v9  ;;  %644 = vmatprep.subr.bf16.mxu1 %v660_v9 }
  0x1f   :  { %620 = vmatpush3.bf16.msra.mxu0 %v660_v9  ;;  %652 = vmatpush3.bf16.msra.mxu1 %v660_v9 }
  0x22   :  { %622 = vmatmul.mubr.bf16.vlgmr.msra.gmra.mrb[0].mxu0 %v662_v10  ;;  %630 = vmatmul.mubr.bf16.vlgmr.msra.gmra.mrb[0].mxu1 %v666_v11 }
  0x23   :  { %625 = vmatprep.mubr.bf16.mxu0 %v663_v12  ;;  %633 = vmatprep.mubr.bf16.mxu1 %v667_v13 }
  0x2a   :  { %626 = vmatmul.mubr.bf16.gmra.mrb[4].mxu0 %v664_v14  ;;  %634 = vmatmul.mubr.bf16.gmra.mrb[4].mxu1 %v668_v15 }
  0xf5   :  { %v623_v16 = vpop.f32.mrb[0].mxu0  ;;  %v737_v17 = vpop.f32.mrb[0].mxu1 }
  0xf6   :  { %v176_v18 = vpop.f32.mrb[1].mxu0  ;;  %v208_v19 = vpop.f32.mrb[1].mxu1 }
  0xf7   :  { %v624_v20 = vpop.f32.mrb[2].mxu0  ;;  %v632_v21 = vpop.f32.mrb[2].mxu1 }
  0xf8   :  { %v550_v22 = vpack.c.bf16 %v624_v20, %v623_v16  ;;  %v179_v23 = vpop.f32.mrb[3].mxu0  ;;  %v570_v24 = vpack.c.bf16 %v632_v21, %v737_v17  ;;  %v211_v25 = vpop.f32.mrb[3].mxu1 }
  0xf9   :  { %v545_v26 = vpack.c.bf16 %v179_v23, %v176_v18  ;;  %v324_v27 = vadd.f32 %v179_v23, %v176_v18  ;;  %v565_v28 = vpack.c.bf16 %v211_v25, %v208_v19 }
  0xfa   :  { %582 = vst [vmem:[%s771_s2 + $0x8] sm:$0xff] %v550_v22   ;;  %586 = vst [vmem:[%s771_s2 + $0x28] sm:$0xff] %v570_v24  }
  0xfb   :  { %546 = vst [vmem:[%s771_s2] sm:$0xff] %v545_v26   ;;  %v325_v29 = vadd.f32 %v623_v16, %v324_v27  ;;  %585 = vst [vmem:[%s771_s2 + $0x20] sm:$0xff] %v565_v28  }
  0xfd   :  { %v627_v30 = vpop.f32.mrb[4].mxu0  ;;  %v326_v31 = vadd.f32 %v624_v20, %v325_v29  ;;  %v635_v32 = vpop.f32.mrb[4].mxu1 }
  0xfe   :  { %v192_v33 = vpop.f32.mrb[5].mxu0  ;;  %v224_v34 = vpop.f32.mrb[5].mxu1 }
  0xff   :  { %v327_v35 = vadd.f32 %v326_v31, %v192_v33  ;;  %v628_v36 = vpop.f32.mrb[6].mxu0  ;;  %v636_v37 = vpop.f32.mrb[6].mxu1 }
 0x100   :  { %v560_v38 = vpack.c.bf16 %v628_v36, %v627_v30  ;;  %v195_v39 = vpop.f32.mrb[7].mxu0  ;;  %v580_v40 = vpack.c.bf16 %v636_v37, %v635_v32  ;;  %v227_v41 = vpop.f32.mrb[7].mxu1 }
 0x101   :  { %v555_v42 = vpack.c.bf16 %v195_v39, %v192_v33  ;;  %v328_v43 = vadd.f32 %v327_v35, %v195_v39  ;;  %v575_v44 = vpack.c.bf16 %v227_v41, %v224_v34 }
 0x102   :  { %584 = vst [vmem:[%s771_s2 + $0x18] sm:$0xff] %v560_v38   ;;  %588 = vst [vmem:[%s771_s2 + $0x38] sm:$0xff] %v580_v40  }
 0x103   :  { %583 = vst [vmem:[%s771_s2 + $0x10] sm:$0xff] %v555_v42   ;;  %v329_v45 = vadd.f32 %v627_v30, %v328_v43  ;;  %587 = vst [vmem:[%s771_s2 + $0x30] sm:$0xff] %v575_v44  }
 0x105   :  { %v330_v46 = vadd.f32 %v628_v36, %v329_v45 }
 0x107   :  { %v331_v47 = vadd.f32 %v330_v46, %v208_v19 }
 0x109   :  { %v332_v48 = vadd.f32 %v331_v47, %v211_v25 }
 0x10b   :  { %v333_v49 = vadd.f32 %v737_v17, %v332_v48 }
 0x10d   :  { %v334_v50 = vadd.f32 %v632_v21, %v333_v49 }
 0x10f   :  { %v335_v51 = vadd.f32 %v334_v50, %v224_v34 }
 0x111   :  { %v336_v52 = vadd.f32 %v335_v51, %v227_v41 }
 0x113   :  { %v337_v53 = vadd.f32 %v635_v32, %v336_v52 }
 0x115   :  { %v338_v54 = vadd.f32 %v636_v37, %v337_v53 }
 0x117   :  { %v339_v55 = vrot.slane %v338_v54, 4 }
 0x119   :  { %v340_v56 = vadd.f32 %v339_v55, %v338_v54 }
 0x11b   :  { %v341_v57 = vrot.slane %v340_v56, 2 }
 0x11d   :  { %v342_v58 = vadd.f32 %v341_v57, %v340_v56 }
 0x11f   :  { %v343_v59 = vrot.slane %v342_v58, 1 }
 0x121   :  { %v344_v60 = vadd.f32 %v343_v59, %v342_v58 }
 0x123   :  { %v347_v61 = vmul.f32 0.0078125, %v344_v60 }
 0x125   :  { %v414_v62 = vsub.f32 %v176_v18, %v347_v61  ;;  %v415_v63 = vsub.f32 %v179_v23, %v347_v61  ;;  %v416_v0 = vsub.f32 %v623_v16, %v347_v61  ;;  %v417_v1 = vsub.f32 %v624_v20, %v347_v61 }
 0x126   :  { %v418_v2 = vsub.f32 %v192_v33, %v347_v61  ;;  %v419_v3 = vsub.f32 %v195_v39, %v347_v61  ;;  %v420_v4 = vsub.f32 %v627_v30, %v347_v61  ;;  %v421_v5 = vsub.f32 %v628_v36, %v347_v61 }
 0x127   :  { %v422_v6 = vsub.f32 %v208_v19, %v347_v61  ;;  %v423_v7 = vsub.f32 %v211_v25, %v347_v61  ;;  %v424_v8 = vsub.f32 %v737_v17, %v347_v61  ;;  %v425_v9 = vsub.f32 %v632_v21, %v347_v61 }
 0x128   :  { %v426_v10 = vsub.f32 %v224_v34, %v347_v61  ;;  %v427_v11 = vsub.f32 %v227_v41, %v347_v61  ;;  %v428_v12 = vsub.f32 %v635_v32, %v347_v61  ;;  %v429_v13 = vsub.f32 %v636_v37, %v347_v61 }
 0x129   :  { %v446_v14 = vmul.f32 %v414_v62, %v414_v62  ;;  %v447_v15 = vmul.f32 %v415_v63, %v415_v63  ;;  %v448_v22 = vmul.f32 %v416_v0, %v416_v0  ;;  %v449_v23 = vmul.f32 %v417_v1, %v417_v1 }
 0x12a   :  { %v450_v20 = vmul.f32 %v418_v2, %v418_v2  ;;  %v451_v26 = vmul.f32 %v419_v3, %v419_v3  ;;  %v452_v28 = vmul.f32 %v420_v4, %v420_v4  ;;  %v453_v25 = vmul.f32 %v421_v5, %v421_v5 }
 0x12b   :  { %v462_v18 = vadd.f32 %v447_v15, %v446_v14  ;;  %v454_v17 = vmul.f32 %v422_v6, %v422_v6  ;;  %v455_v30 = vmul.f32 %v423_v7, %v423_v7  ;;  %v456_v32 = vmul.f32 %v424_v8, %v424_v8 }
 0x12c   :  { %v457_v34 = vmul.f32 %v425_v9, %v425_v9  ;;  %v458_v36 = vmul.f32 %v426_v10, %v426_v10  ;;  %v459_v38 = vmul.f32 %v427_v11, %v427_v11  ;;  %v460_v40 = vmul.f32 %v428_v12, %v428_v12 }
 0x12d   :  { %v463_v16 = vadd.f32 %v462_v18, %v448_v22  ;;  %v461_v42 = vmul.f32 %v429_v13, %v429_v13 }
 0x12f   :  { %v464_v24 = vadd.f32 %v463_v16, %v449_v23 }
 0x131   :  { %v465_v27 = vadd.f32 %v464_v24, %v450_v20 }
 0x133   :  { %v466_v19 = vadd.f32 %v465_v27, %v451_v26 }
 0x135   :  { %v467_v29 = vadd.f32 %v466_v19, %v452_v28 }
 0x137   :  { %v468_v21 = vadd.f32 %v467_v29, %v453_v25 }
 0x139   :  { %v469_v31 = vadd.f32 %v468_v21, %v454_v17 }
 0x13b   :  { %v470_v33 = vadd.f32 %v469_v31, %v455_v30 }
 0x13d   :  { %v471_v35 = vadd.f32 %v470_v33, %v456_v32 }
 0x13f   :  { %v472_v37 = vadd.f32 %v471_v35, %v457_v34 }
 0x141   :  { %v473_v39 = vadd.f32 %v472_v37, %v458_v36 }
 0x143   :  { %v474_v41 = vadd.f32 %v473_v39, %v459_v38 }
 0x145   :  { %v475_v43 = vadd.f32 %v474_v41, %v460_v40 }
 0x147   :  { %v476_v44 = vadd.f32 %v475_v43, %v461_v42 }
 0x149   :  { %v477_v45 = vrot.slane %v476_v44, 4 }
 0x14b   :  { %v478_v46 = vadd.f32 %v477_v45, %v476_v44 }
 0x14d   :  { %v479_v47 = vrot.slane %v478_v46, 2 }
 0x14f   :  { %v480_v48 = vadd.f32 %v479_v47, %v478_v46 }
 0x151   :  { %v481_v49 = vrot.slane %v480_v48, 1 }
 0x153   :  { %v482_v50 = vadd.f32 %v481_v49, %v480_v48 }
 0x155   :  { %v484_v51 = vsel %vm483_vm0, %v344_v60, %v482_v50 }
 0x156   :  { %485 = vst [vmem:[%s772_s3] sm:$0x3] %v484_v51 }

</bundles_post_ra>
